<compile_context>
chip_gen: v7x
topology: tpu7x:2x2x1
jax: 0.10.0
libtpu: 0.0.40
codegen_flags: <defaults>
</compile_context>

<pallas_src>
import jax
import jax.numpy as jnp
import numpy as np
from jax import lax
from jax.experimental import pallas as pl
from jax.experimental.pallas import tpu as pltpu


def sa_kernel(x_ref, wq_ref, bq_ref, wv_ref, bv_ref, gamma_ref,
              attn_ref, att_ref):
    """One (batch b, query-tile q) grid step.

    x_ref    : (1, N, C)   full batch element (resident across query tiles)
    wq_ref   : (C, C+1)    [Wq @ Wk^T | Wq @ bk]     folded query/key proj
    bq_ref   : (1, C+1)    [bq @ Wk^T | bq . bk]
    wv_ref   : (C, C)      value projection weight
    bv_ref   : (1, C)      value projection bias
    gamma_ref: (1,) SMEM   gamma scalar
    attn_ref : (1, TQ, N)  softmax attention tile (f32)
    att_ref  : (1, TQ, C)  gamma * (attn @ v) tile (f32)
    """
    tq = attn_ref.shape[1]
    c = x_ref.shape[2]
    q0 = pl.multiple_of(pl.program_id(1) * tq, tq)

    x_full = x_ref[0]                              # (N, C)
    x_q = x_ref[0, pl.ds(q0, tq), :]               # (TQ, C)

    # Folded Q/K projection for the query rows (single fused matmul).
    pq = jnp.dot(x_q, wq_ref[...], preferred_element_type=jnp.float32) + bq_ref[...]
    # Value projection (fused 1x1 conv) for all keys.
    v = jnp.dot(x_full, wv_ref[...], preferred_element_type=jnp.float32) + bv_ref[...]

    # energy[i, j] = q_i . k_j, computed with a C-wide contraction and no
    # materialized transpose:  (x_i Wq Wk^T + bq Wk^T) . x_j + (x_i Wq + bq).bk
    energy = lax.dot_general(
        pq[:, :c], x_full,
        dimension_numbers=(((1,), (1,)), ((), ())),
        preferred_element_type=jnp.float32)        # (TQ, N)
    energy = energy + pq[:, c:]                    # per-query-row bias term

    # Row softmax (torch Softmax(dim=-1)), kept in f32 (v5e-safe).
    m = jnp.max(energy, axis=-1, keepdims=True)
    p = jnp.exp(energy - m)
    s = jnp.sum(p, axis=-1, keepdims=True)
    r = pl.reciprocal(s, approx=True)              # EUP slot
    r = r * (2.0 - s * r)                          # one Newton step -> ~f32 accuracy
    attn = p * r
    attn_ref[0] = attn

    # attn @ v on the MXU with bf16 operands / f32 accumulation.
    out = jnp.dot(attn.astype(jnp.bfloat16), v.astype(jnp.bfloat16),
                  preferred_element_type=jnp.float32)        # (TQ, C)
    att_ref[0] = gamma_ref[0] * out


def _pick_tq(n):
    # One query tile per grid step; the full key dimension stays resident.
    if n <= 256:
        return n
    for tq in (256, 128):
        if n % tq == 0:
            return tq
    return n


def sa_module(x_nchw, hha_nchw, params):
    B, C, H, W = x_nchw.shape
    N = H * W
    TQ = _pick_tq(N)

    # NCHW -> (B, N, C), n = h*W + w (same ordering as torch .view(B, C, H*W)).
    x_nc = jnp.transpose(x_nchw, (0, 2, 3, 1)).reshape(B, N, C)

    wq, bq = params["wq"], params["bq"]      # (C, Cq), (1, Cq)
    wk, bk = params["wk"], params["bk"]
    wv, bv = params["wv"], params["bv"]

    # Fold the query/key 1x1 convs so the energy matmul contracts over C:
    #   energy[i, j] = (x_i Wq + bq) . (x_j Wk + bk)
    #               = (x_i (Wq Wk^T) + bq Wk^T) . x_j + (x_i (Wq bk) + bq.bk)
    wq_fused = jnp.concatenate([wq @ wk.T, (wq @ bk[0])[:, None]], axis=1)     # (C, C+1)
    bq_fused = jnp.concatenate([wk @ bq[0], (bq[0] @ bk[0])[None]])[None, :]   # (1, C+1)
    gamma_s = params["gamma"].reshape(1).astype(jnp.float32)                   # (1,) -> SMEM

    attn, att_nc = pl.pallas_call(
        sa_kernel,
        grid=(B, N // TQ),
        in_specs=[
            pl.BlockSpec((1, N, C), lambda b, q: (b, 0, 0)),       # x (full batch element)
            pl.BlockSpec((C, C + 1), lambda b, q: (0, 0)),         # folded Q/K weight
            pl.BlockSpec((1, C + 1), lambda b, q: (0, 0)),         # folded Q/K bias
            pl.BlockSpec((C, C), lambda b, q: (0, 0)),             # value weight
            pl.BlockSpec((1, C), lambda b, q: (0, 0)),             # value bias
            pl.BlockSpec(memory_space=pltpu.MemorySpace.SMEM),     # gamma scalar
        ],
        out_specs=[
            pl.BlockSpec((1, TQ, N), lambda b, q: (b, q, 0)),      # attention tile
            pl.BlockSpec((1, TQ, C), lambda b, q: (b, q, 0)),      # gamma * (attn @ v)
        ],
        out_shape=[
            jax.ShapeDtypeStruct((B, N, N), jnp.float32),
            jax.ShapeDtypeStruct((B, N, C), jnp.float32),
        ],
        compiler_params=pltpu.CompilerParams(
            dimension_semantics=("parallel", "parallel"),
            vmem_limit_bytes=48 * 1024 * 1024,
        ),
    )(x_nc, wq_fused, bq_fused, wv, bv, gamma_s)

    # Residual adds outside the kernel (removes the hha input stream and one
    # (B,N,C) output stream from the kernel); back to NCHW like PyTorch.
    attend_nchw = jnp.transpose(att_nc.reshape(B, H, W, C), (0, 3, 1, 2))
    rgb_out = attend_nchw + x_nchw
    hha_out = attend_nchw + hha_nchw
    return attn, rgb_out, hha_out


def sa_ref(x, hha, params):
    """Pure-JAX reference mirroring the PyTorch forward exactly (NCHW)."""
    B, C, H, W = x.shape
    N = H * W

    def conv1x1(inp, w, b):  # w: (C_in, C_out), b: (1, C_out)
        return jnp.einsum('bchw,co->bohw', inp, w) + b[0][None, :, None, None]

    q = conv1x1(x, params["wq"], params["bq"]).reshape(B, -1, N).transpose(0, 2, 1)
    k = conv1x1(x, params["wk"], params["bk"]).reshape(B, -1, N)
    energy = jnp.einsum('bnd,bdm->bnm', q, k)
    attention = jax.nn.softmax(energy, axis=-1)
    v = conv1x1(x, params["wv"], params["bv"]).reshape(B, -1, N)
    out = jnp.einsum('bcn,bmn->bcm', v, attention)      # bmm(v, attention^T)
    attend_out = out.reshape(B, C, H, W)
    g = params["gamma"][0, 0]
    return attention, g * attend_out + x, g * attend_out + hha


if __name__ == "__main__":
    key = jax.random.PRNGKey(0)
    B, C, H, W = 2, 32, 8, 8          # in_dim = 32 -> query/key channels = 4
    Cq = C // 8
    ks = jax.random.split(key, 8)

    x = jax.random.normal(ks[0], (B, C, H, W), jnp.float32)
    hha = jax.random.normal(ks[1], (B, C, H, W), jnp.float32)

    # Conv2d(1x1) weights stored pre-transposed as (C_in, C_out); biases as (1, C_out).
    params = {
        "wq": 0.1 * jax.random.normal(ks[2], (C, Cq), jnp.float32),
        "bq": 0.1 * jax.random.normal(ks[3], (1, Cq), jnp.float32),
        "wk": 0.1 * jax.random.normal(ks[4], (C, Cq), jnp.float32),
        "bk": 0.1 * jax.random.normal(ks[5], (1, Cq), jnp.float32),
        "wv": 0.1 * jax.random.normal(ks[6], (C, C), jnp.float32),
        "bv": 0.1 * jax.random.normal(ks[7], (1, C), jnp.float32),
        # PyTorch inits gamma to 0; use a deterministic nonzero value so the
        # attention branch actually contributes to the outputs.
        "gamma": jnp.full((1, 1), 0.5, jnp.float32),
    }

    attn, rgb_out, hha_out = jax.block_until_ready(sa_module(x, hha, params))
    a_ref, r_ref, h_ref = sa_ref(x, hha, params)

    assert attn.shape == (B, H * W, H * W)
    assert rgb_out.shape == (B, C, H, W) and hha_out.shape == (B, C, H, W)
    # Attention map stays f32 end-to-end.
    assert np.allclose(np.asarray(attn), np.asarray(a_ref), rtol=1e-4, atol=1e-5)
    # rgb/hha tolerances account for the bf16-operand attn@v matmul (f32 accum).
    assert np.allclose(np.asarray(rgb_out), np.asarray(r_ref), rtol=5e-3, atol=5e-3)
    assert np.allclose(np.asarray(hha_out), np.asarray(h_ref), rtol=5e-3, atol=5e-3)

    print("KERNEL_OK")
</pallas_src>

<mosaic_0001>
module attributes {stable_mosaic.version = 11 : i64} {
  func.func @sa_kernel(%arg0: i32, %arg1: i32, %arg2: memref<1x64x32xf32, #tpu.memory_space<vmem>>, %arg3: memref<32x33xf32, #tpu.memory_space<vmem>>, %arg4: memref<1x33xf32, #tpu.memory_space<vmem>>, %arg5: memref<32x32xf32, #tpu.memory_space<vmem>>, %arg6: memref<1x32xf32, #tpu.memory_space<vmem>>, %arg7: memref<1xf32, #tpu.memory_space<smem>>, %arg8: memref<1x64x64xf32, #tpu.memory_space<vmem>>, %arg9: memref<1x64x32xf32, #tpu.memory_space<vmem>>) attributes {dimension_semantics = [#tpu.dimension_semantics<parallel>, #tpu.dimension_semantics<parallel>], iteration_bounds = array<i64: 2, 1>, scalar_prefetch = 0 : i64, scratch_operands = 0 : i64, tpu.core_type = #tpu.core_type<tc>, window_params = [{transform_indices = @transform_0, window_bounds = array<i64: 1, 64, 32>}, {pipeline_mode = #tpu.pipeline_mode<synchronous>, transform_indices = @transform_1, window_bounds = array<i64: 32, 33>}, {pipeline_mode = #tpu.pipeline_mode<synchronous>, transform_indices = @transform_2, window_bounds = array<i64: 1, 33>}, {pipeline_mode = #tpu.pipeline_mode<synchronous>, transform_indices = @transform_3, window_bounds = array<i64: 32, 32>}, {pipeline_mode = #tpu.pipeline_mode<synchronous>, transform_indices = @transform_4, window_bounds = array<i64: 1, 32>}, {transform_indices = @transform_5, window_bounds = array<i64: 1>}, {transform_indices = @transform_6, window_bounds = array<i64: 1, 64, 64>}, {transform_indices = @transform_7, window_bounds = array<i64: 1, 64, 32>}]} {
    %c64_i32 = arith.constant 64 : i32
    %0 = arith.muli %arg1, %c64_i32 : i32
    %1 = tpu.assume_multiple %0, 64 : i32
    %c0 = arith.constant 0 : index
    %c0_0 = arith.constant 0 : index
    %c0_1 = arith.constant 0 : index
    %2 = vector.load %arg2[%c0, %c0_0, %c0_1] : memref<1x64x32xf32, #tpu.memory_space<vmem>>, vector<1x64x32xf32>
    %3 = vector.shape_cast %2 : vector<1x64x32xf32> to vector<64x32xf32>
    %c0_2 = arith.constant 0 : index
    %4 = arith.index_cast %1 : i32 to index
    %c0_3 = arith.constant 0 : index
    %5 = vector.load %arg2[%c0_2, %4, %c0_3] : memref<1x64x32xf32, #tpu.memory_space<vmem>>, vector<1x64x32xf32>
    %6 = vector.shape_cast %5 : vector<1x64x32xf32> to vector<64x32xf32>
    %c0_4 = arith.constant 0 : index
    %c0_5 = arith.constant 0 : index
    %7 = vector.load %arg3[%c0_4, %c0_5] : memref<32x33xf32, #tpu.memory_space<vmem>>, vector<32x33xf32>
    %cst = arith.constant dense<0.000000e+00> : vector<64x33xf32>
    %8 = tpu.matmul %6, %7, %cst {dimension_numbers = #tpu.dot_dimension_numbers<[1], [0], [0], [1], [0, 0, 1, 1], [], []>} : vector<64x32xf32>, vector<32x33xf32>, vector<64x33xf32> -> vector<64x33xf32>
    %c0_6 = arith.constant 0 : index
    %c0_7 = arith.constant 0 : index
    %9 = vector.load %arg4[%c0_6, %c0_7] : memref<1x33xf32, #tpu.memory_space<vmem>>, vector<1x33xf32>
    %10 = vector.broadcast %9 : vector<1x33xf32> to vector<64x33xf32>
    %11 = arith.addf %8, %10 : vector<64x33xf32>
    %c0_8 = arith.constant 0 : index
    %c0_9 = arith.constant 0 : index
    %12 = vector.load %arg5[%c0_8, %c0_9] : memref<32x32xf32, #tpu.memory_space<vmem>>, vector<32x32xf32>
    %cst_10 = arith.constant dense<0.000000e+00> : vector<64x32xf32>
    %13 = tpu.matmul %3, %12, %cst_10 {dimension_numbers = #tpu.dot_dimension_numbers<[1], [0], [0], [1], [0, 0, 1, 1], [], []>} : vector<64x32xf32>, vector<32x32xf32>, vector<64x32xf32> -> vector<64x32xf32>
    %c0_11 = arith.constant 0 : index
    %c0_12 = arith.constant 0 : index
    %14 = vector.load %arg6[%c0_11, %c0_12] : memref<1x32xf32, #tpu.memory_space<vmem>>, vector<1x32xf32>
    %15 = vector.broadcast %14 : vector<1x32xf32> to vector<64x32xf32>
    %16 = arith.addf %13, %15 : vector<64x32xf32>
    %17 = vector.extract_strided_slice %11 {offsets = [0, 0], sizes = [64, 32], strides = [1, 1]} : vector<64x33xf32> to vector<64x32xf32>
    %cst_13 = arith.constant dense<0.000000e+00> : vector<64x64xf32>
    %18 = tpu.matmul %17, %3, %cst_13 {dimension_numbers = #tpu.dot_dimension_numbers<[1], [1], [0], [0], [0, 0, 1, 0], [], []>} : vector<64x32xf32>, vector<64x32xf32>, vector<64x64xf32> -> vector<64x64xf32>
    %19 = vector.extract_strided_slice %11 {offsets = [0, 32], sizes = [64, 1], strides = [1, 1]} : vector<64x33xf32> to vector<64x1xf32>
    %20 = vector.broadcast %19 : vector<64x1xf32> to vector<64x64xf32>
    %21 = arith.addf %18, %20 : vector<64x64xf32>
    %cst_14 = arith.constant dense<0xFF800000> : vector<64xf32>
    %22 = vector.multi_reduction <maximumf>, %21, %cst_14 [1] : vector<64x64xf32> to vector<64xf32>
    %23 = vector.shape_cast %22 : vector<64xf32> to vector<64x1xf32>
    %24 = vector.broadcast %23 : vector<64x1xf32> to vector<64x64xf32>
    %25 = arith.subf %21, %24 : vector<64x64xf32>
    %26 = math.exp %25 : vector<64x64xf32>
    %cst_15 = arith.constant dense<0.000000e+00> : vector<64xf32>
    %27 = vector.multi_reduction <add>, %26, %cst_15 [1] : vector<64x64xf32> to vector<64xf32>
    %28 = vector.shape_cast %27 : vector<64xf32> to vector<64x1xf32>
    %29 = tpu.reciprocal %28 {approx = true} : vector<64x1xf32> -> vector<64x1xf32>
    %30 = arith.mulf %28, %29 : vector<64x1xf32>
    %cst_16 = arith.constant 2.000000e+00 : f32
    %31 = vector.broadcast %cst_16 : f32 to vector<64x1xf32>
    %32 = arith.subf %31, %30 : vector<64x1xf32>
    %33 = arith.mulf %29, %32 : vector<64x1xf32>
    %34 = vector.broadcast %33 : vector<64x1xf32> to vector<64x64xf32>
    %35 = arith.mulf %26, %34 : vector<64x64xf32>
    %c0_17 = arith.constant 0 : index
    %c0_18 = arith.constant 0 : index
    %c0_19 = arith.constant 0 : index
    %36 = vector.load %arg8[%c0_17, %c0_18, %c0_19] : memref<1x64x64xf32, #tpu.memory_space<vmem>>, vector<1x64x64xf32>
    %37 = vector.shape_cast %36 : vector<1x64x64xf32> to vector<64x64xf32>
    %38 = vector.shape_cast %35 : vector<64x64xf32> to vector<1x64x64xf32>
    tpu.vector_store %arg8[%c0_17, %c0_18, %c0_19], %38 {strides = array<i32>} : memref<1x64x64xf32, #tpu.memory_space<vmem>>, vector<1x64x64xf32>,
    %39 = arith.truncf %35 : vector<64x64xf32> to vector<64x64xbf16>
    %40 = arith.truncf %16 : vector<64x32xf32> to vector<64x32xbf16>
    %cst_20 = arith.constant dense<0.000000e+00> : vector<64x32xf32>
    %41 = tpu.matmul %39, %40, %cst_20 {dimension_numbers = #tpu.dot_dimension_numbers<[1], [0], [0], [1], [0, 0, 1, 1], [], []>} : vector<64x64xbf16>, vector<64x32xbf16>, vector<64x32xf32> -> vector<64x32xf32>
    %c0_21 = arith.constant 0 : index
    %42 = memref.load %arg7[%c0_21] : memref<1xf32, #tpu.memory_space<smem>>
    %43 = vector.broadcast %42 : f32 to vector<64x32xf32>
    %44 = arith.mulf %43, %41 : vector<64x32xf32>
    %c0_22 = arith.constant 0 : index
    %c0_23 = arith.constant 0 : index
    %c0_24 = arith.constant 0 : index
    %45 = vector.load %arg9[%c0_22, %c0_23, %c0_24] : memref<1x64x32xf32, #tpu.memory_space<vmem>>, vector<1x64x32xf32>
    %46 = vector.shape_cast %45 : vector<1x64x32xf32> to vector<64x32xf32>
    %47 = vector.shape_cast %44 : vector<64x32xf32> to vector<1x64x32xf32>
    tpu.vector_store %arg9[%c0_22, %c0_23, %c0_24], %47 {strides = array<i32>} : memref<1x64x32xf32, #tpu.memory_space<vmem>>, vector<1x64x32xf32>,
    return
  }
  func.func @transform_0(%arg0: i32, %arg1: i32) -> (i32, i32, i32) {
    %c0_i32 = arith.constant 0 : i32
    %c0_i32_0 = arith.constant 0 : i32
    %c0_i32_1 = arith.constant 0 : i32
    return %arg0, %c0_i32, %c0_i32_0 : i32, i32, i32
  }
  func.func @transform_1(%arg0: i32, %arg1: i32) -> (i32, i32) {
    %c0_i32 = arith.constant 0 : i32
    %c0_i32_0 = arith.constant 0 : i32
    %c0_i32_1 = arith.constant 0 : i32
    return %c0_i32, %c0_i32_0 : i32, i32
  }
  func.func @transform_2(%arg0: i32, %arg1: i32) -> (i32, i32) {
    %c0_i32 = arith.constant 0 : i32
    %c0_i32_0 = arith.constant 0 : i32
    %c0_i32_1 = arith.constant 0 : i32
    return %c0_i32, %c0_i32_0 : i32, i32
  }
  func.func @transform_3(%arg0: i32, %arg1: i32) -> (i32, i32) {
    %c0_i32 = arith.constant 0 : i32
    %c0_i32_0 = arith.constant 0 : i32
    %c0_i32_1 = arith.constant 0 : i32
    return %c0_i32, %c0_i32_0 : i32, i32
  }
  func.func @transform_4(%arg0: i32, %arg1: i32) -> (i32, i32) {
    %c0_i32 = arith.constant 0 : i32
    %c0_i32_0 = arith.constant 0 : i32
    %c0_i32_1 = arith.constant 0 : i32
    return %c0_i32, %c0_i32_0 : i32, i32
  }
  func.func @transform_5(%arg0: i32, %arg1: i32) -> i32 {
    %c0_i32 = arith.constant 0 : i32
    %c0_i32_0 = arith.constant 0 : i32
    return %c0_i32 : i32
  }
  func.func @transform_6(%arg0: i32, %arg1: i32) -> (i32, i32, i32) {
    %c0_i32 = arith.constant 0 : i32
    %c0_i32_0 = arith.constant 0 : i32
    return %arg0, %arg1, %c0_i32 : i32, i32, i32
  }
  func.func @transform_7(%arg0: i32, %arg1: i32) -> (i32, i32, i32) {
    %c0_i32 = arith.constant 0 : i32
    %c0_i32_0 = arith.constant 0 : i32
    return %arg0, %arg1, %c0_i32 : i32, i32, i32
  }
}

</mosaic_0001>

<bundles_post_ra>
// kernel: tpu_custom_call.1
= control target key start
LH: loop header
LB: loop body
LE: loop exit
PB: predicated region body
PF: predicated region fallthrough
CT: control target
= control target key end

     0   :  { %s1904_s0 = inlined_call_operand.vmem [shape: f32[2,64,32], index: 0, kind: input, shape index: {}]   ;;  %s1905_s1 = inlined_call_operand.vmem [shape: f32[32,33], index: 1, kind: input, shape index: {}]   ;;  %s1906_s2 = inlined_call_operand.vmem [shape: f32[1,33], index: 2, kind: input, shape index: {}]   ;;  %s1907_s3 = inlined_call_operand.vmem [shape: f32[32,32], index: 3, kind: input, shape index: {}]   ;;  %s1908_s4 = inlined_call_operand.vmem [shape: f32[1,32], index: 4, kind: input, shape index: {}]   ;;  %s1909_s5 = inlined_call_operand.<no memory space> [shape: f32[1], index: 5, kind: input, shape index: {}]   ;;  %s1910_s6 = inlined_call_operand.hbm [shape: f32[2,64,64], index: 6, kind: output, shape index: {0}]   ;;  %s1911_s7 = inlined_call_operand.vmem [shape: f32[2,64,32], index: 7, kind: output, shape index: {1}]  }
   0x1   :  { %13 = sst [smem:[#allocation2]] %s1909_s5 }
   0x2   :  { %14 = vsyncpa [#allocation4], 0 }
   0x3   :  { %16 = vsyncpa [#allocation4 + $0x1], 0  ;;  %s1590_s26 = smov 0   ;;  %s1592_s27 = smov 0  }
   0x4   :  { %s1594_s28 = smov 0   ;;  %s1596_s29 = smov 0  }
   0x5   :  { %s1598_s30 = smov 0   ;;  %s1600_s8 = smov 0  }
   0x6 LB: > { %s1143_s5 = sadd.s32 4294967295, %s1541_s8   ;;  %s1144_s9 = sadd.s32 4294967294, %s1541_s8   ;;  %s1541_s8 = sphi %s1600_s8, %s22_s8   ;;  %s1537_s30 = sphi %s1598_s30, %s1920_s30   ;;  %s1533_s29 = sphi %s1596_s29, %s1919_s29   ;;  %s1529_s28 = sphi %s1594_s28, %s1918_s28   ;;  %s1525_s27 = sphi %s1592_s27, %s1917_s27   ;;  %s1521_s26 = sphi %s1590_s26, %s1916_s26  }
   0x7   : > { %s34_s10 = sadd.s32 1, %s1537_s30  ;;  %s174_s11 = sadd.s32 1, %s1529_s28 }
   0x8   : > { %p36_p0 = scmp.ge.s32.totalorder %s34_s10, 2  ;;  %p184_p1 = scmp.ne.s32.totalorder %s1529_s28, %s1525_s27 }
   0x9   : > { %p185_p2 = scmp.eq.s32.totalorder %s1143_s5, 1  ;;  %p190_p3 = scmp.ne.s32.totalorder %s1525_s27, %s1521_s26 }
   0xa   : > { %s1922_s10 = smov (%p36_p0, %s34_s10), 0  ;;  %p191_p5 = scmp.eq.s32.totalorder %s1144_s9, 1 }
   0xb   : > { %p1630_p4 = por %p185_p2, %p184_p1  ;;  %s169_s13 = ssub.s32 %s1537_s30, %s1922_s10 }
   0xc   : > { %p1147_p6 = scmp.ge.s32.totalorder %s1541_s8, 1  ;;  %p172_p7 = scmp.eq.s32.totalorder %s169_s13, 0 }
   0xd   : > { %p1637_p8 = por %p191_p5, %p190_p3  ;;  %p260_p9 = scmp.lt.s32.totalorder %s1541_s8, 3 }
   0xe   : > { %s1643_s15 = scalar_select %p172_p7, %s1529_s28, %s174_s11  }
   0xf   : > { %p261_p10 = pnand %p1147_p6, %p260_p9 }
  0x10   : > { %v336_v0 = vld [vmem:[%s1905_s1] sm:$0xff] (!%p261_p10)  ;;  %v337_v1 = vld [vmem:[%s1905_s1 + $0x8] sm:$0xff] (!%p261_p10)  ;;  %v338_v2 = vld [vmem:[%s1905_s1 + $0x10] sm:$0xff] (!%p261_p10)  ;;  %p301_p11 = scmp.lt.s32.totalorder (!%p261_p10), %s1533_s29, 1  ;;  %vm347_vm0 = vcmask (!%p261_p10), 261120   ;;  %v1543_v19 = vmov (!%p261_p10), 32  }
  0x11   : > { %264 = sbr.rel (%p261_p10) target bundleno = 1018 (0x3fa), region = 44  ;;  %v1331_v3 = vpack.c.bf16 (!%p261_p10), %v337_v1, %v336_v0  ;;  %v339_v4 = vld [vmem:[%s1905_s1 + $0x18] sm:$0xff] (!%p261_p10)  ;;  %vm1671_vm1 = vmpackc.low (!%p261_p10), %vm347_vm0, %vm347_vm0  ;;  %1429 = vset.pattern.permute.xlu0 (!%p261_p10), %v1543_v19  ;;  %1430 = vset.pattern.permute.xlu1 (!%p261_p10), %v1543_v19  ;;  %v1153_v20 = vld [vmem:[%s1906_s2] ss:$0 sm:$0xff] (!%p261_p10)  ;;  %vm778_vm2 = vcmask (!%p261_p10), 523264   ;;  %s287_s13 = sand.u32 (!%p261_p10), 1, %s1525_s27  }
  0x12   : > { %v1335_v5 = vpack.c.bf16 (!%p261_p10), %v339_v4, %v338_v2  ;;  %v477_v37 = vld [vmem:[%s1907_s3] sm:$0xff] (!%p261_p10)  ;;  %v478_v38 = vld [vmem:[%s1907_s3 + $0x8] sm:$0xff] (!%p261_p10)  ;;  %v479_v39 = vld [vmem:[%s1907_s3 + $0x10] sm:$0xff] (!%p261_p10)  ;;  %s1148_s16 = sshll.u32 (!%p261_p10), %s287_s13, 6  ;;  %s1198_s18 = sshll.u32 (!%p261_p10), %s1533_s29, 10 }
  0x13   : > { %1332 = vmatprep.subr.bf16.mxu0 (!%p261_p10), %v1331_v3  ;;  %v1339_v40 = vpack.c.bf16 (!%p261_p10), %v478_v38, %v477_v37  ;;  %v480_v41 = vld [vmem:[%s1907_s3 + $0x18] sm:$0xff] (!%p261_p10)  ;;  %s1806_s17 = scalar_lea.vmem (!%p261_p10), [#allocation3], %s1148_s16  ;;  %s1839_s22 = scalar_lea.hbm (!%p261_p10), %s1910_s6, %s1198_s18 }
  0x14   : > { %1334 = vmatpush3.bf16.msra.mxu0 (!%p261_p10), %v1331_v3  ;;  %v1343_v42 = vpack.c.bf16 (!%p261_p10), %v480_v41, %v479_v39  ;;  %s1027_s19 = sshll.u32 (!%p261_p10), %s1806_s17, 4  ;;  %s1845_s23 = scalar_lea.sflag (!%p261_p10), [#allocation4], %s287_s13  ;;  %s1841_s19 = int_to_ptr.vmem [resolvable:$true] %s1027_s19 }
  0x15   : > { %1336 = vmatprep.subr.bf16.mxu0 (!%p261_p10), %v1335_v5  ;;  %1340 = vmatprep.subr.bf16.mxu1 (!%p261_p10), %v1339_v40  ;;  %s1463_s5 = scalar_lea.vmem (!%p261_p10), %s1841_s19, 1024 }
  0x16   : > { %1342 = vmatpush3.bf16.msra.mxu1 (!%p261_p10), %v1339_v40  ;;  %p1464_p12 = scmp.ne.s32.totalorder (!%p261_p10), %s1841_s19, %s1463_s5 }
  0x17   : > { %1344 = vmatprep.subr.bf16.mxu1 (!%p261_p10), %v1343_v42 }
  0x18   : > { %s1659_s24 = scalar_select %p301_p11, %s1533_s29, 1  ;;  %1338 = vmatpush3.bf16.msra.mxu0 %v1335_v5 }
  0x19   : > { %p1465_p13 = pnand %p1464_p12, %p1630_p4  ;;  %s1544_s29 = smov [#allocation3]  }
  0x1a   : > { %s1196_s25 = sshll.u32 %s1659_s24, 6  ;;  %1346 = vmatpush3.bf16.msra.mxu1 %v1343_v42  ;;  %s1467_s9 = sshll.u32 %s1544_s29, 4  ;;  %s1468_s9 = int_to_ptr.vmem [resolvable:$false] %s1467_s9 }
  0x1b   : > { %s305_s11 = scalar_lea.vmem %s1904_s0, %s1196_s25  ;;  %p1466_p0 = pneg %p1465_p13 }
  0x1c   : > { %v328_v6 = vld [vmem:[%s305_s11] sm:$0xff]  ;;  %v1667_v7 = vld [vmem:[%s305_s11 + $0x8] sm:$0xff]  ;;  %v1678_v10 = vld [vmem:[%s305_s11 + $0x10] sm:$0xff]  ;;  %p1470_p1 = scmp.lt.s32.totalorder %s1841_s19, %s1468_s9 }
  0x1d   : > { %1255 = vmatprep.mubr.msk.f32.mxu0 %vm347_vm0, %v328_v6  ;;  %v1347_v9 = vpack.c.bf16 %v1667_v7, %v328_v6  ;;  %1275 = vmatprep.mubr.msk.f32.mxu1 %vm347_vm0, %v328_v6  ;;  %v1686_v11 = vld [vmem:[%s305_s11 + $0x18] sm:$0xff]  ;;  %v1688_v12 = vld [vmem:[%s305_s11 + $0x20] sm:$0xff]  ;;  %v1696_v14 = vld [vmem:[%s305_s11 + $0x28] sm:$0xff] }
  0x1e   : > { %1256 = vmatmul.mubr.msk.f32.vlgmr.msra.gmra.mrb[0].mxu0 %vm347_vm0, %v1667_v7  ;;  %v1353_v13 = vpack.c.bf16 %v1686_v11, %v1678_v10  ;;  %v1698_v15 = vld [vmem:[%s305_s11 + $0x30] sm:$0xff]  ;;  %v335_v16 = vld [vmem:[%s305_s11 + $0x38] sm:$0xff]  ;;  %v1359_v17 = vpack.c.bf16 %v1696_v14, %v1688_v12  ;;  %1276 = vmatmul.mubr.msk.f32.vlgmr.msra.gmra.mrb[0].mxu1 %vm347_vm0, %v1667_v7  ;;  %s1469_s11 = scalar_lea.vmem %s1468_s9, 2048 }
  0x1f   : > { %1349 = vmatprep.subr.msk.bf16.mxu0 %vm1671_vm1, %v1347_v9  ;;  %1258 = vmatprep.mubr.msk.f32.mxu0 %vm347_vm0, %v1678_v10  ;;  %v1365_v18 = vpack.c.bf16 %v335_v16, %v1698_v15  ;;  %p1471_p2 = scmp.lt.s32.totalorder %s1469_s11, %s1463_s5 }
  0x20   : > { %1278 = vmatprep.mubr.msk.f32.mxu1 %vm347_vm0, %v1678_v10 }
  0x21   : > { %1352 = vmatpush3.bf16.xpose.msk.msra.mxu0 %vm1671_vm1, %v1347_v9  ;;  %p1472_p3 = por %p1471_p2, %p1470_p1 }
  0x22   : > { %1259 = vmatmul.mubr.msk.f32.gmra.mrb[2].mxu0 %vm347_vm0, %v1686_v11  ;;  %1355 = vmatprep.subr.msk.bf16.mxu0 %vm1671_vm1, %v1353_v13 }
  0x23   : > { %1261 = vmatprep.mubr.msk.f32.mxu0 %vm347_vm0, %v1688_v12  ;;  %1279 = vmatmul.mubr.msk.f32.gmra.mrb[2].mxu1 %vm347_vm0, %v1686_v11  ;;  %p1473_p5 = pnand %p1472_p3, %p1466_p0 }
  0x24   : > { %1281 = vmatprep.mubr.msk.f32.mxu1 %vm347_vm0, %v1688_v12 }
  0x26   : > { %1262 = vmatmul.mubr.msk.f32.gmra.mrb[4].mxu0 %vm347_vm0, %v1696_v14 }
  0x27   : > { %1264 = vmatprep.mubr.msk.f32.mxu0 %vm347_vm0, %v1698_v15  ;;  %1282 = vmatmul.mubr.msk.f32.gmra.mrb[4].mxu1 %vm347_vm0, %v1696_v14 }
  0x28   : > { %1284 = vmatprep.mubr.msk.f32.mxu1 %vm347_vm0, %v1698_v15 }
  0x29   : > { %1358 = vmatpush3.bf16.xpose.msk.msra.mxu0 %vm1671_vm1, %v1353_v13 }
  0x2a   : > { %1265 = vmatmul.mubr.msk.f32.gmra.mrb[6].mxu0 %vm347_vm0, %v335_v16  ;;  %1361 = vmatprep.subr.msk.bf16.mxu0 %vm1671_vm1, %v1359_v17 }
  0x2b   : > { %1285 = vmatmul.mubr.msk.f32.gmra.mrb[6].mxu1 %vm347_vm0, %v335_v16 }
  0x31   : > { %1364 = vmatpush3.bf16.xpose.msk.msra.mxu0 %vm1671_vm1, %v1359_v17 }
  0x32   : > { %1367 = vmatprep.subr.msk.bf16.mxu0 %vm1671_vm1, %v1365_v18 }
  0x39   : > { %1370 = vmatpush3.bf16.xpose.msk.msra.mxu0 %vm1671_vm1, %v1365_v18 }
  0xf1   : > { %v1257_v21 = vpop.f32.mrb[0].mxu0 }
  0xf2   : > { %v438_v22 = vpop.f32.mrb[1].mxu0  ;;  %v444_v24 = vadd.f32 %v1257_v21, %v1153_v20 }
  0xf3   : > { %v439_v23 = vadd.f32 %v1153_v20, %v438_v22 }
  0xf5   : > { %v1260_v25 = vpop.f32.mrb[2].mxu0  ;;  %619 = vperm.xlu0 %1429, %v439_v23   ;;  %1303 = vmatprep.mubr.msk.f32.mxu0 %vm347_vm0, %v439_v23 }
  0xf6   : > { %v454_v26 = vadd.f32 %v1260_v25, %v1153_v20  ;;  %v448_v27 = vpop.f32.mrb[3].mxu0  ;;  %1304 = vmatmul.mubr.msk.f32.vlgmr.msra.gmra.mrb[8].mxu0 %vm347_vm0, %v444_v24 }
  0xf7   : > { %v449_v28 = vadd.f32 %v1153_v20, %v448_v27 }
  0xf8   : > { %634 = vperm.xlu1 %1430, %v454_v26  }
  0xf9   : > { %v1263_v29 = vpop.f32.mrb[4].mxu0  ;;  %624 = vperm.xlu0 %1429, %v444_v24   ;;  %1306 = vmatprep.mubr.msk.f32.mxu0 %vm347_vm0, %v449_v28 }
  0xfa   : > { %v464_v30 = vadd.f32 %v1263_v29, %v1153_v20  ;;  %v458_v31 = vpop.f32.mrb[5].mxu0  ;;  %1307 = vmatmul.mubr.msk.f32.gmra.mrb[10].mxu0 %vm347_vm0, %v454_v26 }
  0xfb   : > { %v459_v32 = vadd.f32 %v1153_v20, %v458_v31 }
  0xfc   : > { %629 = vperm.xlu1 %1430, %v449_v28  }
  0xfd   : > { %v1266_v33 = vpop.f32.mrb[6].mxu0  ;;  %1309 = vmatprep.mubr.msk.f32.mxu0 %vm347_vm0, %v459_v32  ;;  %639 = vperm.xlu0 %1429, %v459_v32  }
  0xfe   : > { %v474_v34 = vadd.f32 %v1266_v33, %v1153_v20  ;;  %v468_v35 = vpop.f32.mrb[7].mxu0  ;;  %1310 = vmatmul.mubr.msk.f32.gmra.mrb[12].mxu0 %vm347_vm0, %v464_v30 }
  0xff   : > { %v469_v36 = vadd.f32 %v1153_v20, %v468_v35 }
 0x100   : > { %644 = vperm.xlu1 %1430, %v464_v30  }
 0x101   : > { %1312 = vmatprep.mubr.msk.f32.mxu0 %vm347_vm0, %v469_v36  ;;  %649 = vperm.xlu0 %1429, %v469_v36  }
 0x102   : > { %1313 = vmatmul.mubr.msk.f32.gmra.mrb[14].mxu0 %vm347_vm0, %v474_v34 }
 0x104   : > { %654 = vperm.xlu1 %1430, %v474_v34  }
 0x174   : > { %v620_v43 = vpop.permute.xlu0 %619 }
 0x177   : > { %v635_v44 = vpop.permute.xlu1 %634 }
 0x178   : > { %v625_v45 = vpop.permute.xlu0 %624 }
 0x17b   : > { %v630_v50 = vpop.permute.xlu1 %629 }
 0x17c   : > { %v640_v56 = vpop.permute.xlu0 %639 }
 0x17f   : > { %v645_v60 = vpop.permute.xlu1 %644 }
 0x180   : > { %v650_v3 = vpop.permute.xlu0 %649 }
 0x183   : > { %v655_v6 = vpop.permute.xlu1 %654 }
 0x1c9   : > { %v1305_v46 = vpop.f32.mrb[8].mxu0 }
 0x1ca   : > { %v745_v47 = vadd.f32 %v1305_v46, %v625_v45  ;;  %v739_v48 = vpop.f32.mrb[9].mxu0 }
 0x1cb   : > { %v740_v49 = vadd.f32 %v739_v48, %v620_v43 }
 0x1cc   : > { %v782_v51 = vsel %vm778_vm2, %v745_v47, -inf }
 0x1cd   : > { %783 = vmax.xlane.f32.xlu1 %v782_v51  ;;  %v1308_v52 = vpop.f32.mrb[10].mxu0  ;;  %v779_v53 = vsel %vm778_vm2, %v740_v49, -inf  ;;  %v1277_v51 = vpop.f32.mrb[0].mxu1 }
 0x1ce   : > { %v755_v54 = vadd.f32 %v1308_v52, %v635_v44  ;;  %v749_v55 = vpop.f32.mrb[11].mxu0  ;;  %780 = vmax.xlane.f32.xlu0 %v779_v53  ;;  %v1162_v52 = vld [vmem:[%s1908_s4] ss:$0 sm:$0xff]  ;;  %v578_v53 = vpop.f32.mrb[1].mxu1 }
 0x1cf   : > { %v750_v58 = vadd.f32 %v749_v55, %v630_v50  ;;  %v579_v55 = vadd.f32 %v1162_v52, %v578_v53 }
 0x1d0   : > { %v788_v57 = vsel %vm778_vm2, %v755_v54, -inf }
 0x1d1   : > { %v1311_v59 = vpop.f32.mrb[12].mxu0  ;;  %v785_v2 = vsel %vm778_vm2, %v750_v58, -inf }
 0x1d2   : > { %v759_v61 = vpop.f32.mrb[13].mxu0  ;;  %789 = vmax.xlane.f32.xlu0 %v788_v57  ;;  %v765_v63 = vadd.f32 %v1311_v59, %v645_v60  ;;  %v1280_v57 = vpop.f32.mrb[2].mxu1 }
 0x1d3   : > { %v760_v62 = vadd.f32 %v759_v61, %v640_v56  ;;  %v594_v59 = vadd.f32 %v1280_v57, %v1162_v52 }
 0x1d4   : > { %v794_v9 = vsel %vm778_vm2, %v765_v63, -inf }
 0x1d5   : > { %v1314_v0 = vpop.f32.mrb[14].mxu0  ;;  %v791_v1 = vsel %vm778_vm2, %v760_v62, -inf }
 0x1d6   : > { %v769_v4 = vpop.f32.mrb[15].mxu0  ;;  %792 = vmax.xlane.f32.xlu1 %v791_v1  ;;  %786 = vmax.xlane.f32.xlu0 %v785_v2  ;;  %v775_v7 = vadd.f32 %v1314_v0, %v655_v6 }
 0x1d7   : > { %v770_v5 = vadd.f32 %v769_v4, %v650_v3 }
 0x1d8   : > { %v800_v10 = vsel %vm778_vm2, %v775_v7, -inf }
 0x1d9   : > { %v797_v8 = vsel %vm778_vm2, %v770_v5, -inf }
 0x1da   : > { %798 = vmax.xlane.f32.xlu1 %v797_v8  ;;  %795 = vmax.xlane.f32.xlu0 %v794_v9 }
 0x1de   : > { %801 = vmax.xlane.f32.xlu0 %v800_v10 }
 0x25a   : > { %v784_v11 = vpop.xlane.xlu1 %783 }
 0x25b   : > { %v804_v12 = vsub.f32 %v745_v47, %v784_v11  ;;  %v781_v13 = vpop.xlane.xlu0 %780 }
 0x25c   : > { %v803_v14 = vsub.f32 %v740_v49, %v781_v13 }
 0x25d   : > { %v813_v15 = vmul.f32 1.442695, %v804_v12 }
 0x25e   : > { %v811_v16 = vmul.f32 1.442695, %v803_v14 }
 0x25f   : > { %1431 = vpow2.f32 %v813_v15  ;;  %v790_v17 = vpop.xlane.xlu0 %789 }
 0x260   : > { %1433 = vpow2.f32 %v811_v16  ;;  %v806_v18 = vsub.f32 %v755_v54, %v790_v17  ;;  %v584_v54 = vadd.f32 %v1277_v51, %v1162_v52 }
 0x262   : > { %v817_v19 = vmul.f32 1.442695, %v806_v18  ;;  %v903_v56 = vpack.c.bf16 %v584_v54, %v579_v55 }
 0x263   : > { %v793_v20 = vpop.xlane.xlu1 %792  ;;  %v787_v21 = vpop.xlane.xlu0 %786 }
 0x264   : > { %1435 = vpow2.f32 %v817_v19  ;;  %v807_v22 = vsub.f32 %v760_v62, %v793_v20  ;;  %v805_v23 = vsub.f32 %v750_v58, %v787_v21  ;;  %v588_v58 = vpop.f32.mrb[3].mxu1  ;;  %1315 = vmatprep.subr.bf16.mxu1 %v903_v56 }
 0x265   : > { %v589_v60 = vadd.f32 %v1162_v52, %v588_v58  ;;  %1316 = vmatpush3.bf16.msra.mxu1 %v903_v56  ;;  %v1283_v62 = vpop.f32.mrb[4].mxu1 }
 0x266   : > { %v815_v24 = vmul.f32 1.442695, %v805_v23  ;;  %v819_v25 = vmul.f32 1.442695, %v807_v22  ;;  %v604_v0 = vadd.f32 %v1283_v62, %v1162_v52 }
 0x267   : > { %v799_v26 = vpop.xlane.xlu1 %798  ;;  %v796_v27 = vpop.xlane.xlu0 %795  ;;  %v904_v61 = vpack.c.bf16 %v594_v59, %v589_v60 }
 0x268   : > { %v809_v28 = vsub.f32 %v770_v5, %v799_v26  ;;  %v808_v29 = vsub.f32 %v765_v63, %v796_v27  ;;  %1437 = vpow2.f32 %v815_v24  ;;  %v598_v63 = vpop.f32.mrb[5].mxu1 }
 0x269   : > { %v1766_v30 = vpop.eup %1431  ;;  %1439 = vpow2.f32 %v819_v25  ;;  %1317 = vmatprep.subr.bf16.mxu1 %v904_v61  ;;  %v599_v1 = vadd.f32 %v1162_v52, %v598_v63  ;;  %v1286_v3 = vpop.f32.mrb[6].mxu1 }
 0x26a   : > { %v1768_v31 = vpop.eup %1433  ;;  %v821_v32 = vmul.f32 1.442695, %v808_v29  ;;  %v830_v33 = vsel %vm778_vm2, %v1766_v30, 0.0  ;;  %v823_v34 = vmul.f32 1.442695, %v809_v28  ;;  %1318 = vmatpush3.bf16.msra.mxu1 %v904_v61  ;;  %v608_v4 = vpop.f32.mrb[7].mxu1  ;;  %v614_v5 = vadd.f32 %v1286_v3, %v1162_v52 }
 0x26b   : > { %831 = vadd.xlane.f32.xlu0 %v830_v33  ;;  %v802_v35 = vpop.xlane.xlu0 %801  ;;  %v827_v36 = vsel %vm778_vm2, %v1768_v31, 0.0  ;;  %v905_v2 = vpack.c.bf16 %v604_v0, %v599_v1  ;;  %v609_v6 = vadd.f32 %v1162_v52, %v608_v4 }
 0x26c   : > { %v810_v37 = vsub.f32 %v775_v7, %v802_v35  ;;  %828 = vadd.xlane.f32.xlu1 %v827_v36  ;;  %1441 = vpow2.f32 %v821_v32 }
 0x26d   : > { %1443 = vpow2.f32 %v823_v34  ;;  %1319 = vmatprep.subr.bf16.mxu1 %v905_v2  ;;  %v906_v7 = vpack.c.bf16 %v614_v5, %v609_v6 }
 0x26e   : > { %v1774_v38 = vpop.eup %1435  ;;  %v825_v39 = vmul.f32 1.442695, %v810_v37  ;;  %1320 = vmatpush3.bf16.msra.mxu1 %v905_v2 }
 0x26f   : > { %v836_v40 = vsel %vm778_vm2, %v1774_v38, 0.0  ;;  %1321 = vmatprep.subr.bf16.mxu1 %v906_v7 }
 0x270   : > { %1445 = vpow2.f32 %v825_v39  ;;  %837 = vadd.xlane.f32.xlu0 %v836_v40 }
 0x272   : > { %v1778_v41 = vpop.eup %1437  ;;  %1322 = vmatpush3.bf16.msra.mxu1 %v906_v7 }
 0x273   : > { %v833_v42 = vsel %vm778_vm2, %v1778_v41, 0.0  ;;  %v1782_v43 = vpop.eup %1439 }
 0x274   : > { %834 = vadd.xlane.f32.xlu1 %v833_v42  ;;  %v839_v45 = vsel %vm778_vm2, %v1782_v43, 0.0 }
 0x276   : > { %v1784_v44 = vpop.eup %1441 }
 0x277   : > { %v842_v46 = vsel %vm778_vm2, %v1784_v44, 0.0  ;;  %v1790_v47 = vpop.eup %1443 }
 0x278   : > { %840 = vadd.xlane.f32.xlu1 %v839_v45  ;;  %843 = vadd.xlane.f32.xlu0 %v842_v46  ;;  %v845_v50 = vsel %vm778_vm2, %v1790_v47, 0.0 }
 0x27a   : > { %v1792_v48 = vpop.eup %1445 }
 0x27b   : > { %v848_v49 = vsel %vm778_vm2, %v1792_v48, 0.0 }
 0x27c   : > { %846 = vadd.xlane.f32.xlu1 %v845_v50  ;;  %849 = vadd.xlane.f32.xlu0 %v848_v49 }
 0x2f8   : > { %v832_v8 = vpop.xlane.xlu0 %831 }
 0x2f9   : > { %1447 = vrcp.f32 %v832_v8  ;;  %v829_v9 = vpop.xlane.xlu1 %828 }
 0x2fa   : > { %1449 = vrcp.f32 %v829_v9 }
 0x2fd   : > { %v838_v10 = vpop.xlane.xlu0 %837 }
 0x2fe   : > { %1451 = vrcp.f32 %v838_v10 }
 0x301   : > { %v835_v11 = vpop.xlane.xlu1 %834 }
 0x302   : > { %1453 = vrcp.f32 %v835_v11 }
 0x303   : > { %v1448_v12 = vpop.eup %1447 }
 0x304   : > { %v1450_v13 = vpop.eup %1449  ;;  %v860_v14 = vmul.f32 %v1448_v12, %v832_v8 }
 0x305   : > { %v859_v15 = vmul.f32 %v1450_v13, %v829_v9  ;;  %v841_v17 = vpop.xlane.xlu1 %840  ;;  %v844_v18 = vpop.xlane.xlu0 %843 }
 0x306   : > { %v868_v16 = vsub.f32 2.0, %v860_v14  ;;  %1455 = vrcp.f32 %v841_v17 }
 0x307   : > { %v867_v19 = vsub.f32 2.0, %v859_v15  ;;  %1457 = vrcp.f32 %v844_v18 }
 0x308   : > { %v1452_v20 = vpop.eup %1451  ;;  %v876_v21 = vmul.f32 %v1448_v12, %v868_v16 }
 0x309   : > { %v875_v22 = vmul.f32 %v1450_v13, %v867_v19  ;;  %v862_v23 = vmul.f32 %v1452_v20, %v838_v10  ;;  %v847_v25 = vpop.xlane.xlu1 %846  ;;  %v850_v26 = vpop.xlane.xlu0 %849 }
 0x30a   : > { %v884_v24 = vmul.f32 %v1766_v30, %v876_v21  ;;  %1459 = vrcp.f32 %v847_v25 }
 0x30b   : > { %v883_v27 = vmul.f32 %v1768_v31, %v875_v22  ;;  %v870_v28 = vsub.f32 2.0, %v862_v23  ;;  %1461 = vrcp.f32 %v850_v26 }
 0x30c   : > { %892 = vst.msk [vmem:[%s1806_s17 + $0x8] sm:$0xff] %vm778_vm2, %v884_v24  ;;  %v1454_v29 = vpop.eup %1453 }
 0x30d   : > { %891 = vst.msk [vmem:[%s1806_s17] sm:$0xff] %vm778_vm2, %v883_v27  ;;  %v878_v32 = vmul.f32 %v1452_v20, %v870_v28  ;;  %v899_v33 = vpack.c.bf16 %v884_v24, %v883_v27  ;;  %v861_v30 = vmul.f32 %v1454_v29, %v835_v11 }
 0x30f   : > { %v886_v34 = vmul.f32 %v1774_v38, %v878_v32  ;;  %1323 = vmatprep.mubr.msk.bf16.mxu1 %vm778_vm2, %v899_v33  ;;  %v869_v31 = vsub.f32 2.0, %v861_v30 }
 0x310   : > { %v1456_v35 = vpop.eup %1455 }
 0x311   : > { %894 = vst.msk [vmem:[%s1806_s17 + $0x18] sm:$0xff] %vm778_vm2, %v886_v34  ;;  %v1458_v36 = vpop.eup %1457  ;;  %v877_v37 = vmul.f32 %v1454_v29, %v869_v31  ;;  %v863_v39 = vmul.f32 %v1456_v35, %v841_v17 }
 0x312   : > { %v864_v40 = vmul.f32 %v1458_v36, %v844_v18 }
 0x313   : > { %v885_v42 = vmul.f32 %v1778_v41, %v877_v37  ;;  %v871_v45 = vsub.f32 2.0, %v863_v39 }
 0x314   : > { %v1460_v46 = vpop.eup %1459  ;;  %v872_v49 = vsub.f32 2.0, %v864_v40 }
 0x315   : > { %v1462_v50 = vpop.eup %1461  ;;  %893 = vst.msk [vmem:[%s1806_s17 + $0x10] sm:$0xff] %vm778_vm2, %v885_v42  ;;  %v900_v38 = vpack.c.bf16 %v886_v34, %v885_v42  ;;  %v879_v51 = vmul.f32 %v1456_v35, %v871_v45  ;;  %v865_v52 = vmul.f32 %v1460_v46, %v847_v25 }
 0x316   : > { %v880_v53 = vmul.f32 %v1458_v36, %v872_v49  ;;  %v866_v54 = vmul.f32 %v1462_v50, %v850_v26 }
 0x317   : > { %v887_v55 = vmul.f32 %v1782_v43, %v879_v51  ;;  %v873_v56 = vsub.f32 2.0, %v865_v52  ;;  %1324 = vmatmul.mubr.msk.bf16.vlgmr.msra.gmra.mrb[8].mxu1 %vm778_vm2, %v900_v38 }
 0x318   : > { %v888_v41 = vmul.f32 %v1784_v44, %v880_v53  ;;  %v874_v57 = vsub.f32 2.0, %v866_v54 }
 0x319   : > { %895 = vst.msk [vmem:[%s1806_s17 + $0x20] sm:$0xff] %vm778_vm2, %v887_v55  ;;  %v881_v58 = vmul.f32 %v1460_v46, %v873_v56 }
 0x31a   : > { %896 = vst.msk [vmem:[%s1806_s17 + $0x28] sm:$0xff] %vm778_vm2, %v888_v41  ;;  %v882_v59 = vmul.f32 %v1462_v50, %v874_v57  ;;  %v901_v60 = vpack.c.bf16 %v888_v41, %v887_v55 }
 0x31b   : > { %v889_v61 = vmul.f32 %v1790_v47, %v881_v58 }
 0x31c   : > { %v890_v43 = vmul.f32 %v1792_v48, %v882_v59  ;;  %1327 = vmatprep.mubr.msk.bf16.mxu1 %vm778_vm2, %v901_v60 }
 0x31d   : > { %897 = vst.msk [vmem:[%s1806_s17 + $0x30] sm:$0xff] %vm778_vm2, %v889_v61 }
 0x31e   : > { %898 = vst.msk [vmem:[%s1806_s17 + $0x38] sm:$0xff] %vm778_vm2, %v890_v43  ;;  %v902_v44 = vpack.c.bf16 %v890_v43, %v889_v61 }
 0x320   : > { %1328 = vmatmul.mubr.msk.bf16.gmra.mrb[12].mxu1 %vm778_vm2, %v902_v44 }
 0x321   : > { %1476 = shalt.err (!%p1473_p5)
}
 0x322   : > { %s1477_s13 = scalar_lea.hbm %s1839_s22, 1024  ;;  %s1481_s18 = scalar_lea.hbm %s1910_s6, 2048 }
 0x323   : > { %p1478_p6 = scmp.ne.s32.totalorder %s1839_s22, %s1477_s13  ;;  %p1482_p10 = scmp.lt.u32.totalorder %s1839_s22, %s1910_s6 }
 0x324   : > { %p1483_p11 = scmp.lt.u32.totalorder %s1481_s18, %s1477_s13  ;;  %p1485_p13 = scmp.lt.u32.totalorder %s1477_s13, %s1839_s22 }
 0x325   : > { %p1479_p7 = pnand %p1478_p6, %p1630_p4 }
 0x326   : > { %p1484_p12 = por %p1483_p11, %p1482_p10 }
 0x327   : > { %p1480_p9 = pneg %p1479_p7 }
 0x328   : > { %p1486_p0 = por %p1485_p13, %p1484_p12 }
 0x32a   : > { %p1487_p1 = pnand %p1486_p0, %p1480_p9 }
 0x32c   : > { %1490 = shalt.err (!%p1487_p1)
}
 0x32d   : > { %s1545_s5 = smov 128   ;;  %s1546_s29 = smov 8  }
 0x32e   : > { %1371 = dma.vmem_to_hbm [thread:$0]  (%p1630_p4), %s1841_s19, 1024, %s1839_s22, %s1845_s23, %s1545_s5, %s1545_s5, %s1546_s29  }
 0x32f   : > { %s984_s9 = sld [smem:[#allocation2]]  ;;  %s315_s17 = scalar_lea.vmem %s1911_s7, %s1196_s25 }
 0x335   : > { %v985_v47 = vstv %s984_s9 }
 0x3ea   : > { %v1325_v48 = vpop.f32.mrb[8].mxu1 }
 0x3eb   : > { %v988_v62 = vmul.f32 %v1325_v48, %v985_v47  ;;  %v953_v63 = vpop.f32.mrb[9].mxu1 }
 0x3ec   : > { %v986_v0 = vmul.f32 %v985_v47, %v953_v63  ;;  %v1326_v1 = vpop.f32.mrb[10].mxu1 }
 0x3ed   : > { %996 = vst.msk [vmem:[%s315_s17 + $0x10] sm:$0xff] %vm347_vm0, %v988_v62  ;;  %v989_v2 = vmul.f32 %v1326_v1, %v985_v47  ;;  %v956_v3 = vpop.f32.mrb[11].mxu1 }
 0x3ee   : > { %994 = vst.msk [vmem:[%s315_s17] sm:$0xff] %vm347_vm0, %v986_v0  ;;  %v987_v4 = vmul.f32 %v985_v47, %v956_v3 }
 0x3ef   : > { %997 = vst.msk [vmem:[%s315_s17 + $0x18] sm:$0xff] %vm347_vm0, %v989_v2 }
 0x3f0   : > { %995 = vst.msk [vmem:[%s315_s17 + $0x8] sm:$0xff] %vm347_vm0, %v987_v4 }
 0x3f3   : > { %v1329_v5 = vpop.f32.mrb[12].mxu1 }
 0x3f4   : > { %v992_v6 = vmul.f32 %v1329_v5, %v985_v47  ;;  %v969_v7 = vpop.f32.mrb[13].mxu1 }
 0x3f5   : > { %v990_v8 = vmul.f32 %v985_v47, %v969_v7  ;;  %v1330_v9 = vpop.f32.mrb[14].mxu1 }
 0x3f6   : > { %1000 = vst.msk [vmem:[%s315_s17 + $0x30] sm:$0xff] %vm347_vm0, %v992_v6  ;;  %v993_v10 = vmul.f32 %v1330_v9, %v985_v47  ;;  %v972_v11 = vpop.f32.mrb[15].mxu1 }
 0x3f7   : > { %998 = vst.msk [vmem:[%s315_s17 + $0x20] sm:$0xff] %vm347_vm0, %v990_v8  ;;  %v991_v12 = vmul.f32 %v985_v47, %v972_v11 }
 0x3f8   : > { %1001 = vst.msk [vmem:[%s315_s17 + $0x38] sm:$0xff] %vm347_vm0, %v993_v10 }
 0x3f9   : > { %999 = vst.msk [vmem:[%s315_s17 + $0x28] sm:$0xff] %vm347_vm0, %v991_v12 }
 0x3fa PF: > { %p1377_p4 = scmp.ge.s32.totalorder %s1541_s8, 2  ;;  %s1046_s12 = sand.u32 1, %s1521_s26  }
 0x3fb   : > { %s1047_s24 = scalar_lea.sflag [#allocation4], %s1046_s12 }
 0x3fc   : > { %p1374_p2 = pnand %p1377_p4, %p1637_p8 }
 0x3fe   : > { %1516 = dma.done.wait (!%p1374_p2), %s1047_s24, 1024  }
 0x3ff   : > { %1518 = vsyncadd (!%p1374_p2), %s1047_s24, 4294966272  ;;  %s22_s8 = sadd.s32 1, %s1541_s8   ;;  %s1916_s26 = smov %s1525_s27 }
 0x400   : > { %p19_p3 = scmp.ge.s32.totalorder %s22_s8, 4   ;;  %s1917_s27 = smov %s1529_s28 }
 0x401   : > { %s1918_s28 = smov %s1643_s15  ;;  %s1919_s29 = smov %s1537_s30 }
 0x402   : > { %s1920_s30 = smov %s1922_s10  ;;  %21 = sbr.rel (!%p19_p3) target bundleno = 6 (0x6), region = 92 }
 0x409   :  { %1064 = vsyncpa [#allocation4], 1 }
 0x40a   :  { %1066 = vsyncpa [#allocation4 + $0x1], 1 }

</bundles_post_ra>
